<compile_context>
chip_gen: v5e
topology: v5e:2x2
jax: 0.10.0
libtpu: 0.0.40
codegen_flags: <defaults>
</compile_context>

<pallas_src>
import functools

import numpy as np

import jax
import jax.numpy as jnp
from jax.experimental import pallas as pl
from jax.experimental.pallas import tpu as pltpu

EPS = 1e-5


def _bn_fold(y, gamma, beta, gat, sct, inv_n, relu):
    """Training-mode BatchNorm on a lane-dense (S, W*C) slab.

    gamma, beta : (1, C) f32
    gat         : (W*C, C) 0/1 gather  (per-channel sum over the W lane groups)
    sct         : (C, W*C) 0/1 scatter (broadcast per-channel scale/shift)
    """
    f32 = jnp.float32
    rs = jnp.sum(y, axis=0, keepdims=True)                        # (1, W*C)
    rss = jnp.sum(y * y, axis=0, keepdims=True)
    mean = jnp.dot(rs, gat, preferred_element_type=f32) * inv_n   # (1, C)
    ex2 = jnp.dot(rss, gat, preferred_element_type=f32) * inv_n
    var = jnp.maximum(ex2 - mean * mean, 0.0)
    scale_c = gamma * jax.lax.rsqrt(var + EPS)                    # (1, C)
    shift_c = beta - mean * scale_c
    scale = jnp.dot(scale_c, sct, preferred_element_type=f32)     # (1, W*C)
    shift = jnp.dot(shift_c, sct, preferred_element_type=f32)
    out = y * scale + shift
    return jnp.maximum(out, 0.0) if relu else out


def _bottleneck_kernel(x_ref, w1_ref, c_ref, w3_ref,
                       gat_p_ref, sct_p_ref, gat_c_ref, sct_c_ref,
                       g1_ref, b1_ref, g2_ref, b2_ref, g3_ref, b3_ref,
                       o_ref, *, inv_n, rows_per_image):
    """Fused Bottleneck block; everything in lane-dense (N*H, W*C) slabs."""
    f32, bf16 = jnp.float32, jnp.bfloat16
    x = x_ref[...]                                                # (S, W*Cin) f32

    # ---- conv1 (1x1) + bn1 + relu: block-diagonal bf16 matmul (K = W*Cin) ---
    y1 = jnp.dot(x.astype(bf16), w1_ref[...], preferred_element_type=f32)
    y1 = _bn_fold(y1, g1_ref[...], b1_ref[...],
                  gat_p_ref[...], sct_p_ref[...], inv_n, relu=True)  # (S, W*P)

    # ---- conv2 (3x3, pad=1) + bn2 + relu ----
    # Row (kh) shifts: XLU sublane rolls + boundary mask (= zero padding), no
    # O(S^2) selection matmuls.  Column (kw) shifts + padding + tap weights
    # are pre-folded into c_ref (one (W*P, W*P) matrix per kh).
    S, WP = y1.shape
    H = rows_per_image
    h_idx = jax.lax.broadcasted_iota(jnp.int32, (S, WP), 0) % H
    down = jnp.where(h_idx != 0, pltpu.roll(y1, shift=1, axis=0), 0.0)        # y1[s-1]
    up = jnp.where(h_idx != H - 1, pltpu.roll(y1, shift=S - 1, axis=0), 0.0)  # y1[s+1]
    taps = (down, y1, up)                                         # kh = 0, 1, 2
    if WP % 128 == 0:
        # Lane-aligned: fuse the three kh taps into one K = 3*W*P matmul.
        cat = jnp.concatenate(taps, axis=-1).astype(bf16)         # (S, 3*W*P)
        y2 = jnp.dot(cat, c_ref[...].reshape(3 * WP, WP),
                     preferred_element_type=f32)
    else:
        y2 = jnp.dot(taps[0].astype(bf16), c_ref[0], preferred_element_type=f32)
        y2 = y2 + jnp.dot(taps[1].astype(bf16), c_ref[1], preferred_element_type=f32)
        y2 = y2 + jnp.dot(taps[2].astype(bf16), c_ref[2], preferred_element_type=f32)
    y2 = _bn_fold(y2, g2_ref[...], b2_ref[...],
                  gat_p_ref[...], sct_p_ref[...], inv_n, relu=True)

    # ---- conv3 (1x1 expansion) + bn3: block-diagonal bf16 matmul ----
    y3 = jnp.dot(y2.astype(bf16), w3_ref[...], preferred_element_type=f32)
    y3 = _bn_fold(y3, g3_ref[...], b3_ref[...],
                  gat_c_ref[...], sct_c_ref[...], inv_n, relu=False)

    # ---- residual add + relu; lane-dense store (last dim = W*Cin) ----
    o_ref[...] = jnp.maximum(y3 + x, 0.0).astype(o_ref.dtype)


def _full_spec(shape):
    nd = len(shape)
    return pl.BlockSpec(shape, lambda *_, nd=nd: (0,) * nd)


def _vmem_limit_bytes(resident_bytes):
    """Generation-aware scoped-VMEM limit (v7x = 64 MiB, v5e/v6e = 128 MiB)."""
    cap = 64 * 1024 * 1024                       # conservative default (v7x)
    try:
        cap = int(pltpu.get_tpu_info().vmem_capacity_bytes)
    except Exception:
        pass
    ceiling = (3 * cap) // 4                     # pipeline / compiler headroom
    need = 2 * resident_bytes + (8 << 20)        # double-buffered + scratch
    return int(max(4 << 20, min(ceiling, need)))


def make_bottleneck_forward(w1, w2, w3, g1, b1, g2, b2, g3, b3, *, n, h, w):
    """Builds a jitted forward(x_nchw) for fixed weights and activation shape.

    All constant matrices are prepared exactly once here (weight-load time).
    """
    p, cin = int(w1.shape[0]), int(w1.shape[1])
    assert cin == 4 * p, "identity residual requires in_planes == planes * 4"
    s_rows, wp, wc = n * h, w * p, w * cin
    f32, bf16 = jnp.float32, jnp.bfloat16

    # 1x1 convs as block-diagonal matmuls over the lane (w, c) axis.
    eye_w = np.eye(w, dtype=np.float32)
    w1_bd = jnp.asarray(np.kron(eye_w, np.asarray(w1)[:, :, 0, 0].T)).astype(bf16)
    w3_bd = jnp.asarray(np.kron(eye_w, np.asarray(w3)[:, :, 0, 0].T)).astype(bf16)

    # conv2 per-kh matrices: kw shift + zero padding + tap weights folded in.
    w2_np = np.asarray(w2)
    c_taps = np.zeros((3, wp, wp), np.float32)
    for kh in range(3):
        for kw in range(3):
            dx = kw - 1
            d = np.eye(w, k=-dx, dtype=np.float32)                # D[w, w-dx] = 1
            c_taps[kh] += np.kron(d, w2_np[:, :, kh, kw].T)
    c_taps = jnp.asarray(c_taps).astype(bf16)                     # (3, W*P, W*P)

    # BN per-channel gather / scatter matrices: O(W*C*C), not O((W*C)^2).
    gat_p_np = np.kron(np.ones((w, 1), np.float32), np.eye(p, dtype=np.float32))
    gat_c_np = np.kron(np.ones((w, 1), np.float32), np.eye(cin, dtype=np.float32))
    gat_p, sct_p = jnp.asarray(gat_p_np), jnp.asarray(np.ascontiguousarray(gat_p_np.T))
    gat_c, sct_c = jnp.asarray(gat_c_np), jnp.asarray(np.ascontiguousarray(gat_c_np.T))

    g1r, b1r = g1.reshape(1, p).astype(f32), b1.reshape(1, p).astype(f32)
    g2r, b2r = g2.reshape(1, p).astype(f32), b2.reshape(1, p).astype(f32)
    g3r, b3r = g3.reshape(1, cin).astype(f32), b3.reshape(1, cin).astype(f32)

    consts = (w1_bd, c_taps, w3_bd, gat_p, sct_p, gat_c, sct_c,
              g1r, b1r, g2r, b2r, g3r, b3r)

    resident = 2 * s_rows * wc * 4                                # x + out slabs
    resident += sum(int(np.prod(a.shape)) * a.dtype.itemsize for a in consts)

    kernel = functools.partial(_bottleneck_kernel,
                               inv_n=1.0 / float(n * h * w),
                               rows_per_image=h)

    call = pl.pallas_call(
        kernel,
        out_shape=jax.ShapeDtypeStruct((s_rows, wc), f32),
        grid_spec=pltpu.PrefetchScalarGridSpec(
            num_scalar_prefetch=0,
            grid=(1,),
            in_specs=[_full_spec((s_rows, wc))]
                     + [_full_spec(a.shape) for a in consts],
            out_specs=_full_spec((s_rows, wc)),
        ),
        compiler_params=pltpu.CompilerParams(
            dimension_semantics=("arbitrary",),
            vmem_limit_bytes=_vmem_limit_bytes(resident),
        ),
    )

    @jax.jit
    def forward(x_nchw):
        x_slab = jnp.transpose(x_nchw, (0, 2, 3, 1)).astype(f32).reshape(s_rows, wc)
        out = call(x_slab, *consts)
        return jnp.transpose(out.reshape(n, h, w, cin), (0, 3, 1, 2))

    return forward


# ---------------- pure-JAX references (for correctness checks) ----------------
def _ref_bn(y_nchw, gamma, beta):
    mean = y_nchw.mean(axis=(0, 2, 3), keepdims=True)
    var = ((y_nchw - mean) ** 2).mean(axis=(0, 2, 3), keepdims=True)
    return ((y_nchw - mean) / jnp.sqrt(var + EPS)
            * gamma[None, :, None, None] + beta[None, :, None, None])


def bottleneck_reference(x, w1, w2, w3, g1, b1, g2, b2, g3, b3,
                         *, bf16_matmul=False):
    """Reference.  bf16_matmul=True mirrors the kernel's bf16 MXU operands
    (f32 accumulation, f32 BN) for a tight structural check."""
    def conv(a, wgt, pad):
        if bf16_matmul:
            a, wgt = a.astype(jnp.bfloat16), wgt.astype(jnp.bfloat16)
        return jax.lax.conv_general_dilated(
            a, wgt, window_strides=(1, 1),
            padding=[(pad, pad), (pad, pad)],
            dimension_numbers=("NCHW", "OIHW", "NCHW"),
            preferred_element_type=jnp.float32)

    out = jax.nn.relu(_ref_bn(conv(x, w1, 0), g1, b1))
    out = jax.nn.relu(_ref_bn(conv(out, w2, 1), g2, b2))
    out = _ref_bn(conv(out, w3, 0), g3, b3)
    return jax.nn.relu(out + x)


if __name__ == "__main__":
    # Bottleneck(in_planes=16, planes=4, stride=1): expansion=4 -> identity residual.
    N, H, W = 2, 8, 8
    planes = 4
    in_planes = planes * 4

    key = jax.random.PRNGKey(0)
    ks = jax.random.split(key, 10)
    x = jax.random.normal(ks[0], (N, in_planes, H, W), jnp.float32)

    w1 = jax.random.normal(ks[1], (planes, in_planes, 1, 1), jnp.float32) * 0.2
    w2 = jax.random.normal(ks[2], (planes, planes, 3, 3), jnp.float32) * 0.2
    w3 = jax.random.normal(ks[3], (planes * 4, planes, 1, 1), jnp.float32) * 0.2

    g1 = 1.0 + 0.1 * jax.random.normal(ks[4], (planes,), jnp.float32)
    b1 = 0.1 * jax.random.normal(ks[5], (planes,), jnp.float32)
    g2 = 1.0 + 0.1 * jax.random.normal(ks[6], (planes,), jnp.float32)
    b2 = 0.1 * jax.random.normal(ks[7], (planes,), jnp.float32)
    g3 = 1.0 + 0.1 * jax.random.normal(ks[8], (planes * 4,), jnp.float32)
    b3 = 0.1 * jax.random.normal(ks[9], (planes * 4,), jnp.float32)

    forward = make_bottleneck_forward(w1, w2, w3, g1, b1, g2, b2, g3, b3,
                                      n=N, h=H, w=W)
    out = jax.block_until_ready(forward(x))
    assert out.shape == (N, in_planes, H, W)

    args = (w1, w2, w3, g1, b1, g2, b2, g3, b3)

    # Tight structural check vs a reference that mirrors the kernel's bf16
    # matmul operands (f32 accumulation, f32 BN).
    ref_bf16 = bottleneck_reference(x, *args, bf16_matmul=True)
    err_tight = float(jnp.max(jnp.abs(out - ref_bf16)))
    assert jnp.allclose(out, ref_bf16, atol=3e-2, rtol=2e-2), (
        f"bf16-matched reference mismatch: max abs err = {err_tight}")

    # Sanity check vs exact f32 module semantics.
    ref_f32 = bottleneck_reference(x, *args, bf16_matmul=False)
    err_f32 = float(jnp.max(jnp.abs(out - ref_f32)))
    assert jnp.allclose(out, ref_f32, atol=0.15, rtol=0.05), (
        f"f32 reference deviation too large: max abs err = {err_f32}")

    print("KERNEL_OK")
</pallas_src>

<mosaic_0001>
module attributes {stable_mosaic.version = 11 : i64} {
  func.func @_bottleneck_kernel(%arg0: i32, %arg1: memref<16x128xf32, #tpu.memory_space<vmem>>, %arg2: memref<128x32xbf16, #tpu.memory_space<vmem>>, %arg3: memref<3x32x32xbf16, #tpu.memory_space<vmem>>, %arg4: memref<32x128xbf16, #tpu.memory_space<vmem>>, %arg5: memref<32x4xf32, #tpu.memory_space<vmem>>, %arg6: memref<4x32xf32, #tpu.memory_space<vmem>>, %arg7: memref<128x16xf32, #tpu.memory_space<vmem>>, %arg8: memref<16x128xf32, #tpu.memory_space<vmem>>, %arg9: memref<1x4xf32, #tpu.memory_space<vmem>>, %arg10: memref<1x4xf32, #tpu.memory_space<vmem>>, %arg11: memref<1x4xf32, #tpu.memory_space<vmem>>, %arg12: memref<1x4xf32, #tpu.memory_space<vmem>>, %arg13: memref<1x16xf32, #tpu.memory_space<vmem>>, %arg14: memref<1x16xf32, #tpu.memory_space<vmem>>, %arg15: memref<16x128xf32, #tpu.memory_space<vmem>>) attributes {dimension_semantics = [#tpu.dimension_semantics<arbitrary>], iteration_bounds = array<i64: 1>, scalar_prefetch = 0 : i64, scratch_operands = 0 : i64, tpu.core_type = #tpu.core_type<tc>, window_params = [{pipeline_mode = #tpu.pipeline_mode<synchronous>, transform_indices = @transform_0, window_bounds = array<i64: 16, 128>}, {pipeline_mode = #tpu.pipeline_mode<synchronous>, transform_indices = @transform_1, window_bounds = array<i64: 128, 32>}, {pipeline_mode = #tpu.pipeline_mode<synchronous>, transform_indices = @transform_2, window_bounds = array<i64: 3, 32, 32>}, {pipeline_mode = #tpu.pipeline_mode<synchronous>, transform_indices = @transform_3, window_bounds = array<i64: 32, 128>}, {pipeline_mode = #tpu.pipeline_mode<synchronous>, transform_indices = @transform_4, window_bounds = array<i64: 32, 4>}, {pipeline_mode = #tpu.pipeline_mode<synchronous>, transform_indices = @transform_5, window_bounds = array<i64: 4, 32>}, {pipeline_mode = #tpu.pipeline_mode<synchronous>, transform_indices = @transform_6, window_bounds = array<i64: 128, 16>}, {pipeline_mode = #tpu.pipeline_mode<synchronous>, transform_indices = @transform_7, window_bounds = array<i64: 16, 128>}, {pipeline_mode = #tpu.pipeline_mode<synchronous>, transform_indices = @transform_8, window_bounds = array<i64: 1, 4>}, {pipeline_mode = #tpu.pipeline_mode<synchronous>, transform_indices = @transform_9, window_bounds = array<i64: 1, 4>}, {pipeline_mode = #tpu.pipeline_mode<synchronous>, transform_indices = @transform_10, window_bounds = array<i64: 1, 4>}, {pipeline_mode = #tpu.pipeline_mode<synchronous>, transform_indices = @transform_11, window_bounds = array<i64: 1, 4>}, {pipeline_mode = #tpu.pipeline_mode<synchronous>, transform_indices = @transform_12, window_bounds = array<i64: 1, 16>}, {pipeline_mode = #tpu.pipeline_mode<synchronous>, transform_indices = @transform_13, window_bounds = array<i64: 1, 16>}, {pipeline_mode = #tpu.pipeline_mode<synchronous>, transform_indices = @transform_14, window_bounds = array<i64: 16, 128>}]} {
    %c0 = arith.constant 0 : index
    %c0_0 = arith.constant 0 : index
    %0 = vector.load %arg1[%c0, %c0_0] : memref<16x128xf32, #tpu.memory_space<vmem>>, vector<16x128xf32>
    %1 = arith.truncf %0 : vector<16x128xf32> to vector<16x128xbf16>
    %c0_1 = arith.constant 0 : index
    %c0_2 = arith.constant 0 : index
    %2 = vector.load %arg2[%c0_1, %c0_2] : memref<128x32xbf16, #tpu.memory_space<vmem>>, vector<128x32xbf16>
    %cst = arith.constant dense<0.000000e+00> : vector<16x32xf32>
    %3 = tpu.matmul %1, %2, %cst {dimension_numbers = #tpu.dot_dimension_numbers<[1], [0], [0], [1], [0, 0, 1, 1], [], []>} : vector<16x128xbf16>, vector<128x32xbf16>, vector<16x32xf32> -> vector<16x32xf32>
    %c0_3 = arith.constant 0 : index
    %c0_4 = arith.constant 0 : index
    %4 = vector.load %arg9[%c0_3, %c0_4] : memref<1x4xf32, #tpu.memory_space<vmem>>, vector<1x4xf32>
    %c0_5 = arith.constant 0 : index
    %c0_6 = arith.constant 0 : index
    %5 = vector.load %arg10[%c0_5, %c0_6] : memref<1x4xf32, #tpu.memory_space<vmem>>, vector<1x4xf32>
    %c0_7 = arith.constant 0 : index
    %c0_8 = arith.constant 0 : index
    %6 = vector.load %arg5[%c0_7, %c0_8] : memref<32x4xf32, #tpu.memory_space<vmem>>, vector<32x4xf32>
    %c0_9 = arith.constant 0 : index
    %c0_10 = arith.constant 0 : index
    %7 = vector.load %arg6[%c0_9, %c0_10] : memref<4x32xf32, #tpu.memory_space<vmem>>, vector<4x32xf32>
    %cst_11 = arith.constant dense<0.000000e+00> : vector<32xf32>
    %8 = vector.multi_reduction <add>, %3, %cst_11 [0] : vector<16x32xf32> to vector<32xf32>
    %9 = vector.shape_cast %8 : vector<32xf32> to vector<1x32xf32>
    %10 = arith.mulf %3, %3 : vector<16x32xf32>
    %cst_12 = arith.constant dense<0.000000e+00> : vector<32xf32>
    %11 = vector.multi_reduction <add>, %10, %cst_12 [0] : vector<16x32xf32> to vector<32xf32>
    %12 = vector.shape_cast %11 : vector<32xf32> to vector<1x32xf32>
    %cst_13 = arith.constant dense<0.000000e+00> : vector<1x4xf32>
    %13 = tpu.matmul %9, %6, %cst_13 {dimension_numbers = #tpu.dot_dimension_numbers<[1], [0], [0], [1], [0, 0, 1, 1], [], []>} : vector<1x32xf32>, vector<32x4xf32>, vector<1x4xf32> -> vector<1x4xf32>
    %cst_14 = arith.constant 7.812500e-03 : f32
    %14 = vector.broadcast %cst_14 : f32 to vector<1x4xf32>
    %15 = arith.mulf %13, %14 : vector<1x4xf32>
    %cst_15 = arith.constant dense<0.000000e+00> : vector<1x4xf32>
    %16 = tpu.matmul %12, %6, %cst_15 {dimension_numbers = #tpu.dot_dimension_numbers<[1], [0], [0], [1], [0, 0, 1, 1], [], []>} : vector<1x32xf32>, vector<32x4xf32>, vector<1x4xf32> -> vector<1x4xf32>
    %cst_16 = arith.constant 7.812500e-03 : f32
    %17 = vector.broadcast %cst_16 : f32 to vector<1x4xf32>
    %18 = arith.mulf %16, %17 : vector<1x4xf32>
    %19 = arith.mulf %15, %15 : vector<1x4xf32>
    %20 = arith.subf %18, %19 : vector<1x4xf32>
    %cst_17 = arith.constant 0.000000e+00 : f32
    %21 = vector.broadcast %cst_17 : f32 to vector<1x4xf32>
    %22 = arith.maximumf %20, %21 : vector<1x4xf32>
    %cst_18 = arith.constant 9.99999974E-6 : f32
    %23 = vector.broadcast %cst_18 : f32 to vector<1x4xf32>
    %24 = arith.addf %22, %23 : vector<1x4xf32>
    %25 = math.rsqrt %24 : vector<1x4xf32>
    %26 = arith.mulf %4, %25 : vector<1x4xf32>
    %27 = arith.mulf %15, %26 : vector<1x4xf32>
    %28 = arith.subf %5, %27 : vector<1x4xf32>
    %cst_19 = arith.constant dense<0.000000e+00> : vector<1x32xf32>
    %29 = tpu.matmul %26, %7, %cst_19 {dimension_numbers = #tpu.dot_dimension_numbers<[1], [0], [0], [1], [0, 0, 1, 1], [], []>} : vector<1x4xf32>, vector<4x32xf32>, vector<1x32xf32> -> vector<1x32xf32>
    %cst_20 = arith.constant dense<0.000000e+00> : vector<1x32xf32>
    %30 = tpu.matmul %28, %7, %cst_20 {dimension_numbers = #tpu.dot_dimension_numbers<[1], [0], [0], [1], [0, 0, 1, 1], [], []>} : vector<1x4xf32>, vector<4x32xf32>, vector<1x32xf32> -> vector<1x32xf32>
    %31 = vector.broadcast %29 : vector<1x32xf32> to vector<16x32xf32>
    %32 = arith.mulf %3, %31 : vector<16x32xf32>
    %33 = vector.broadcast %30 : vector<1x32xf32> to vector<16x32xf32>
    %34 = arith.addf %32, %33 : vector<16x32xf32>
    %cst_21 = arith.constant 0.000000e+00 : f32
    %35 = vector.broadcast %cst_21 : f32 to vector<16x32xf32>
    %36 = arith.maximumf %34, %35 : vector<16x32xf32>
    %37 = tpu.iota {dimensions = array<i32: 0>} : vector<16x32xi32>
    %c8_i32 = arith.constant 8 : i32
    %c0_i32 = arith.constant 0 : i32
    %38 = arith.cmpi eq, %c8_i32, %c0_i32 : i32
    %c1_i32 = arith.constant 1 : i32
    %39 = arith.select %38, %c1_i32, %c8_i32 : i32
    %40 = vector.broadcast %39 : i32 to vector<16x32xi32>
    %41 = arith.remsi %37, %40 : vector<16x32xi32>
    %c0_i32_22 = arith.constant 0 : i32
    %42 = vector.broadcast %c0_i32_22 : i32 to vector<16x32xi32>
    %43 = arith.cmpi ne, %41, %42 : vector<16x32xi32>
    %c0_i32_23 = arith.constant 0 : i32
    %44 = vector.broadcast %c0_i32_23 : i32 to vector<16x32xi32>
    %45 = arith.cmpi slt, %41, %44 : vector<16x32xi32>
    %c0_i32_24 = arith.constant 0 : i32
    %46 = arith.cmpi slt, %39, %c0_i32_24 : i32
    %47 = vector.broadcast %46 : i1 to vector<16x32xi1>
    %48 = vector.broadcast %47 : vector<16x32xi1> to vector<16x32xi1>
    %49 = arith.xori %45, %48 : vector<16x32xi1>
    %50 = arith.andi %49, %43 : vector<16x32xi1>
    %51 = vector.broadcast %39 : i32 to vector<16x32xi32>
    %52 = arith.addi %41, %51 : vector<16x32xi32>
    %53 = arith.select %50, %52, %41 : vector<16x32xi1>, vector<16x32xi32>
    %c0_i32_25 = arith.constant 0 : i32
    %54 = vector.broadcast %c0_i32_25 : i32 to vector<16x32xi32>
    %55 = arith.cmpi ne, %53, %54 : vector<16x32xi32>
    %c1_i32_26 = arith.constant 1 : i32
    %56 = tpu.dynamic_rotate %36 by %c1_i32_26 dim 0 : vector<16x32xf32>, i32 -> vector<16x32xf32>
    %cst_27 = arith.constant 0.000000e+00 : f32
    %57 = vector.broadcast %cst_27 : f32 to vector<16x32xf32>
    %58 = arith.select %55, %56, %57 : vector<16x32xi1>, vector<16x32xf32>
    %c7_i32 = arith.constant 7 : i32
    %59 = vector.broadcast %c7_i32 : i32 to vector<16x32xi32>
    %60 = arith.cmpi ne, %53, %59 : vector<16x32xi32>
    %c15_i32 = arith.constant 15 : i32
    %61 = tpu.dynamic_rotate %36 by %c15_i32 dim 0 : vector<16x32xf32>, i32 -> vector<16x32xf32>
    %cst_28 = arith.constant 0.000000e+00 : f32
    %62 = vector.broadcast %cst_28 : f32 to vector<16x32xf32>
    %63 = arith.select %60, %61, %62 : vector<16x32xi1>, vector<16x32xf32>
    %64 = arith.truncf %58 : vector<16x32xf32> to vector<16x32xbf16>
    %c0_29 = arith.constant 0 : index
    %c0_30 = arith.constant 0 : index
    %c0_31 = arith.constant 0 : index
    %65 = vector.load %arg3[%c0_29, %c0_30, %c0_31] : memref<3x32x32xbf16, #tpu.memory_space<vmem>>, vector<1x32x32xbf16>
    %66 = vector.shape_cast %65 : vector<1x32x32xbf16> to vector<32x32xbf16>
    %cst_32 = arith.constant dense<0.000000e+00> : vector<16x32xf32>
    %67 = tpu.matmul %64, %66, %cst_32 {dimension_numbers = #tpu.dot_dimension_numbers<[1], [0], [0], [1], [0, 0, 1, 1], [], []>} : vector<16x32xbf16>, vector<32x32xbf16>, vector<16x32xf32> -> vector<16x32xf32>
    %68 = arith.truncf %36 : vector<16x32xf32> to vector<16x32xbf16>
    %c1 = arith.constant 1 : index
    %c0_33 = arith.constant 0 : index
    %c0_34 = arith.constant 0 : index
    %69 = vector.load %arg3[%c1, %c0_33, %c0_34] : memref<3x32x32xbf16, #tpu.memory_space<vmem>>, vector<1x32x32xbf16>
    %70 = vector.shape_cast %69 : vector<1x32x32xbf16> to vector<32x32xbf16>
    %cst_35 = arith.constant dense<0.000000e+00> : vector<16x32xf32>
    %71 = tpu.matmul %68, %70, %cst_35 {dimension_numbers = #tpu.dot_dimension_numbers<[1], [0], [0], [1], [0, 0, 1, 1], [], []>} : vector<16x32xbf16>, vector<32x32xbf16>, vector<16x32xf32> -> vector<16x32xf32>
    %72 = arith.addf %67, %71 : vector<16x32xf32>
    %73 = arith.truncf %63 : vector<16x32xf32> to vector<16x32xbf16>
    %c2 = arith.constant 2 : index
    %c0_36 = arith.constant 0 : index
    %c0_37 = arith.constant 0 : index
    %74 = vector.load %arg3[%c2, %c0_36, %c0_37] : memref<3x32x32xbf16, #tpu.memory_space<vmem>>, vector<1x32x32xbf16>
    %75 = vector.shape_cast %74 : vector<1x32x32xbf16> to vector<32x32xbf16>
    %cst_38 = arith.constant dense<0.000000e+00> : vector<16x32xf32>
    %76 = tpu.matmul %73, %75, %cst_38 {dimension_numbers = #tpu.dot_dimension_numbers<[1], [0], [0], [1], [0, 0, 1, 1], [], []>} : vector<16x32xbf16>, vector<32x32xbf16>, vector<16x32xf32> -> vector<16x32xf32>
    %77 = arith.addf %72, %76 : vector<16x32xf32>
    %c0_39 = arith.constant 0 : index
    %c0_40 = arith.constant 0 : index
    %78 = vector.load %arg11[%c0_39, %c0_40] : memref<1x4xf32, #tpu.memory_space<vmem>>, vector<1x4xf32>
    %c0_41 = arith.constant 0 : index
    %c0_42 = arith.constant 0 : index
    %79 = vector.load %arg12[%c0_41, %c0_42] : memref<1x4xf32, #tpu.memory_space<vmem>>, vector<1x4xf32>
    %c0_43 = arith.constant 0 : index
    %c0_44 = arith.constant 0 : index
    %80 = vector.load %arg5[%c0_43, %c0_44] : memref<32x4xf32, #tpu.memory_space<vmem>>, vector<32x4xf32>
    %c0_45 = arith.constant 0 : index
    %c0_46 = arith.constant 0 : index
    %81 = vector.load %arg6[%c0_45, %c0_46] : memref<4x32xf32, #tpu.memory_space<vmem>>, vector<4x32xf32>
    %cst_47 = arith.constant dense<0.000000e+00> : vector<32xf32>
    %82 = vector.multi_reduction <add>, %77, %cst_47 [0] : vector<16x32xf32> to vector<32xf32>
    %83 = vector.shape_cast %82 : vector<32xf32> to vector<1x32xf32>
    %84 = arith.mulf %77, %77 : vector<16x32xf32>
    %cst_48 = arith.constant dense<0.000000e+00> : vector<32xf32>
    %85 = vector.multi_reduction <add>, %84, %cst_48 [0] : vector<16x32xf32> to vector<32xf32>
    %86 = vector.shape_cast %85 : vector<32xf32> to vector<1x32xf32>
    %cst_49 = arith.constant dense<0.000000e+00> : vector<1x4xf32>
    %87 = tpu.matmul %83, %80, %cst_49 {dimension_numbers = #tpu.dot_dimension_numbers<[1], [0], [0], [1], [0, 0, 1, 1], [], []>} : vector<1x32xf32>, vector<32x4xf32>, vector<1x4xf32> -> vector<1x4xf32>
    %cst_50 = arith.constant 7.812500e-03 : f32
    %88 = vector.broadcast %cst_50 : f32 to vector<1x4xf32>
    %89 = arith.mulf %87, %88 : vector<1x4xf32>
    %cst_51 = arith.constant dense<0.000000e+00> : vector<1x4xf32>
    %90 = tpu.matmul %86, %80, %cst_51 {dimension_numbers = #tpu.dot_dimension_numbers<[1], [0], [0], [1], [0, 0, 1, 1], [], []>} : vector<1x32xf32>, vector<32x4xf32>, vector<1x4xf32> -> vector<1x4xf32>
    %cst_52 = arith.constant 7.812500e-03 : f32
    %91 = vector.broadcast %cst_52 : f32 to vector<1x4xf32>
    %92 = arith.mulf %90, %91 : vector<1x4xf32>
    %93 = arith.mulf %89, %89 : vector<1x4xf32>
    %94 = arith.subf %92, %93 : vector<1x4xf32>
    %cst_53 = arith.constant 0.000000e+00 : f32
    %95 = vector.broadcast %cst_53 : f32 to vector<1x4xf32>
    %96 = arith.maximumf %94, %95 : vector<1x4xf32>
    %cst_54 = arith.constant 9.99999974E-6 : f32
    %97 = vector.broadcast %cst_54 : f32 to vector<1x4xf32>
    %98 = arith.addf %96, %97 : vector<1x4xf32>
    %99 = math.rsqrt %98 : vector<1x4xf32>
    %100 = arith.mulf %78, %99 : vector<1x4xf32>
    %101 = arith.mulf %89, %100 : vector<1x4xf32>
    %102 = arith.subf %79, %101 : vector<1x4xf32>
    %cst_55 = arith.constant dense<0.000000e+00> : vector<1x32xf32>
    %103 = tpu.matmul %100, %81, %cst_55 {dimension_numbers = #tpu.dot_dimension_numbers<[1], [0], [0], [1], [0, 0, 1, 1], [], []>} : vector<1x4xf32>, vector<4x32xf32>, vector<1x32xf32> -> vector<1x32xf32>
    %cst_56 = arith.constant dense<0.000000e+00> : vector<1x32xf32>
    %104 = tpu.matmul %102, %81, %cst_56 {dimension_numbers = #tpu.dot_dimension_numbers<[1], [0], [0], [1], [0, 0, 1, 1], [], []>} : vector<1x4xf32>, vector<4x32xf32>, vector<1x32xf32> -> vector<1x32xf32>
    %105 = vector.broadcast %103 : vector<1x32xf32> to vector<16x32xf32>
    %106 = arith.mulf %77, %105 : vector<16x32xf32>
    %107 = vector.broadcast %104 : vector<1x32xf32> to vector<16x32xf32>
    %108 = arith.addf %106, %107 : vector<16x32xf32>
    %cst_57 = arith.constant 0.000000e+00 : f32
    %109 = vector.broadcast %cst_57 : f32 to vector<16x32xf32>
    %110 = arith.maximumf %108, %109 : vector<16x32xf32>
    %111 = arith.truncf %110 : vector<16x32xf32> to vector<16x32xbf16>
    %c0_58 = arith.constant 0 : index
    %c0_59 = arith.constant 0 : index
    %112 = vector.load %arg4[%c0_58, %c0_59] : memref<32x128xbf16, #tpu.memory_space<vmem>>, vector<32x128xbf16>
    %cst_60 = arith.constant dense<0.000000e+00> : vector<16x128xf32>
    %113 = tpu.matmul %111, %112, %cst_60 {dimension_numbers = #tpu.dot_dimension_numbers<[1], [0], [0], [1], [0, 0, 1, 1], [], []>} : vector<16x32xbf16>, vector<32x128xbf16>, vector<16x128xf32> -> vector<16x128xf32>
    %c0_61 = arith.constant 0 : index
    %c0_62 = arith.constant 0 : index
    %114 = vector.load %arg13[%c0_61, %c0_62] : memref<1x16xf32, #tpu.memory_space<vmem>>, vector<1x16xf32>
    %c0_63 = arith.constant 0 : index
    %c0_64 = arith.constant 0 : index
    %115 = vector.load %arg14[%c0_63, %c0_64] : memref<1x16xf32, #tpu.memory_space<vmem>>, vector<1x16xf32>
    %c0_65 = arith.constant 0 : index
    %c0_66 = arith.constant 0 : index
    %116 = vector.load %arg7[%c0_65, %c0_66] : memref<128x16xf32, #tpu.memory_space<vmem>>, vector<128x16xf32>
    %c0_67 = arith.constant 0 : index
    %c0_68 = arith.constant 0 : index
    %117 = vector.load %arg8[%c0_67, %c0_68] : memref<16x128xf32, #tpu.memory_space<vmem>>, vector<16x128xf32>
    %cst_69 = arith.constant dense<0.000000e+00> : vector<128xf32>
    %118 = vector.multi_reduction <add>, %113, %cst_69 [0] : vector<16x128xf32> to vector<128xf32>
    %119 = vector.shape_cast %118 : vector<128xf32> to vector<1x128xf32>
    %120 = arith.mulf %113, %113 : vector<16x128xf32>
    %cst_70 = arith.constant dense<0.000000e+00> : vector<128xf32>
    %121 = vector.multi_reduction <add>, %120, %cst_70 [0] : vector<16x128xf32> to vector<128xf32>
    %122 = vector.shape_cast %121 : vector<128xf32> to vector<1x128xf32>
    %cst_71 = arith.constant dense<0.000000e+00> : vector<1x16xf32>
    %123 = tpu.matmul %119, %116, %cst_71 {dimension_numbers = #tpu.dot_dimension_numbers<[1], [0], [0], [1], [0, 0, 1, 1], [], []>} : vector<1x128xf32>, vector<128x16xf32>, vector<1x16xf32> -> vector<1x16xf32>
    %cst_72 = arith.constant 7.812500e-03 : f32
    %124 = vector.broadcast %cst_72 : f32 to vector<1x16xf32>
    %125 = arith.mulf %123, %124 : vector<1x16xf32>
    %cst_73 = arith.constant dense<0.000000e+00> : vector<1x16xf32>
    %126 = tpu.matmul %122, %116, %cst_73 {dimension_numbers = #tpu.dot_dimension_numbers<[1], [0], [0], [1], [0, 0, 1, 1], [], []>} : vector<1x128xf32>, vector<128x16xf32>, vector<1x16xf32> -> vector<1x16xf32>
    %cst_74 = arith.constant 7.812500e-03 : f32
    %127 = vector.broadcast %cst_74 : f32 to vector<1x16xf32>
    %128 = arith.mulf %126, %127 : vector<1x16xf32>
    %129 = arith.mulf %125, %125 : vector<1x16xf32>
    %130 = arith.subf %128, %129 : vector<1x16xf32>
    %cst_75 = arith.constant 0.000000e+00 : f32
    %131 = vector.broadcast %cst_75 : f32 to vector<1x16xf32>
    %132 = arith.maximumf %130, %131 : vector<1x16xf32>
    %cst_76 = arith.constant 9.99999974E-6 : f32
    %133 = vector.broadcast %cst_76 : f32 to vector<1x16xf32>
    %134 = arith.addf %132, %133 : vector<1x16xf32>
    %135 = math.rsqrt %134 : vector<1x16xf32>
    %136 = arith.mulf %114, %135 : vector<1x16xf32>
    %137 = arith.mulf %125, %136 : vector<1x16xf32>
    %138 = arith.subf %115, %137 : vector<1x16xf32>
    %cst_77 = arith.constant dense<0.000000e+00> : vector<1x128xf32>
    %139 = tpu.matmul %136, %117, %cst_77 {dimension_numbers = #tpu.dot_dimension_numbers<[1], [0], [0], [1], [0, 0, 1, 1], [], []>} : vector<1x16xf32>, vector<16x128xf32>, vector<1x128xf32> -> vector<1x128xf32>
    %cst_78 = arith.constant dense<0.000000e+00> : vector<1x128xf32>
    %140 = tpu.matmul %138, %117, %cst_78 {dimension_numbers = #tpu.dot_dimension_numbers<[1], [0], [0], [1], [0, 0, 1, 1], [], []>} : vector<1x16xf32>, vector<16x128xf32>, vector<1x128xf32> -> vector<1x128xf32>
    %141 = vector.broadcast %139 : vector<1x128xf32> to vector<16x128xf32>
    %142 = arith.mulf %113, %141 : vector<16x128xf32>
    %143 = vector.broadcast %140 : vector<1x128xf32> to vector<16x128xf32>
    %144 = arith.addf %142, %143 : vector<16x128xf32>
    %145 = arith.addf %144, %0 : vector<16x128xf32>
    %cst_79 = arith.constant 0.000000e+00 : f32
    %146 = vector.broadcast %cst_79 : f32 to vector<16x128xf32>
    %147 = arith.maximumf %145, %146 : vector<16x128xf32>
    %c0_80 = arith.constant 0 : index
    %c0_81 = arith.constant 0 : index
    %148 = vector.load %arg15[%c0_80, %c0_81] : memref<16x128xf32, #tpu.memory_space<vmem>>, vector<16x128xf32>
    tpu.vector_store %arg15[%c0_80, %c0_81], %147 {strides = array<i32>} : memref<16x128xf32, #tpu.memory_space<vmem>>, vector<16x128xf32>,
    return
  }
  func.func @transform_0(%arg0: i32) -> (i32, i32) {
    %c0_i32 = arith.constant 0 : i32
    %c0_i32_0 = arith.constant 0 : i32
    %c0_i32_1 = arith.constant 0 : i32
    return %c0_i32, %c0_i32_0 : i32, i32
  }
  func.func @transform_1(%arg0: i32) -> (i32, i32) {
    %c0_i32 = arith.constant 0 : i32
    %c0_i32_0 = arith.constant 0 : i32
    %c0_i32_1 = arith.constant 0 : i32
    return %c0_i32, %c0_i32_0 : i32, i32
  }
  func.func @transform_2(%arg0: i32) -> (i32, i32, i32) {
    %c0_i32 = arith.constant 0 : i32
    %c0_i32_0 = arith.constant 0 : i32
    %c0_i32_1 = arith.constant 0 : i32
    %c0_i32_2 = arith.constant 0 : i32
    return %c0_i32, %c0_i32_0, %c0_i32_1 : i32, i32, i32
  }
  func.func @transform_3(%arg0: i32) -> (i32, i32) {
    %c0_i32 = arith.constant 0 : i32
    %c0_i32_0 = arith.constant 0 : i32
    %c0_i32_1 = arith.constant 0 : i32
    return %c0_i32, %c0_i32_0 : i32, i32
  }
  func.func @transform_4(%arg0: i32) -> (i32, i32) {
    %c0_i32 = arith.constant 0 : i32
    %c0_i32_0 = arith.constant 0 : i32
    %c0_i32_1 = arith.constant 0 : i32
    return %c0_i32, %c0_i32_0 : i32, i32
  }
  func.func @transform_5(%arg0: i32) -> (i32, i32) {
    %c0_i32 = arith.constant 0 : i32
    %c0_i32_0 = arith.constant 0 : i32
    %c0_i32_1 = arith.constant 0 : i32
    return %c0_i32, %c0_i32_0 : i32, i32
  }
  func.func @transform_6(%arg0: i32) -> (i32, i32) {
    %c0_i32 = arith.constant 0 : i32
    %c0_i32_0 = arith.constant 0 : i32
    %c0_i32_1 = arith.constant 0 : i32
    return %c0_i32, %c0_i32_0 : i32, i32
  }
  func.func @transform_7(%arg0: i32) -> (i32, i32) {
    %c0_i32 = arith.constant 0 : i32
    %c0_i32_0 = arith.constant 0 : i32
    %c0_i32_1 = arith.constant 0 : i32
    return %c0_i32, %c0_i32_0 : i32, i32
  }
  func.func @transform_8(%arg0: i32) -> (i32, i32) {
    %c0_i32 = arith.constant 0 : i32
    %c0_i32_0 = arith.constant 0 : i32
    %c0_i32_1 = arith.constant 0 : i32
    return %c0_i32, %c0_i32_0 : i32, i32
  }
  func.func @transform_9(%arg0: i32) -> (i32, i32) {
    %c0_i32 = arith.constant 0 : i32
    %c0_i32_0 = arith.constant 0 : i32
    %c0_i32_1 = arith.constant 0 : i32
    return %c0_i32, %c0_i32_0 : i32, i32
  }
  func.func @transform_10(%arg0: i32) -> (i32, i32) {
    %c0_i32 = arith.constant 0 : i32
    %c0_i32_0 = arith.constant 0 : i32
    %c0_i32_1 = arith.constant 0 : i32
    return %c0_i32, %c0_i32_0 : i32, i32
  }
  func.func @transform_11(%arg0: i32) -> (i32, i32) {
    %c0_i32 = arith.constant 0 : i32
    %c0_i32_0 = arith.constant 0 : i32
    %c0_i32_1 = arith.constant 0 : i32
    return %c0_i32, %c0_i32_0 : i32, i32
  }
  func.func @transform_12(%arg0: i32) -> (i32, i32) {
    %c0_i32 = arith.constant 0 : i32
    %c0_i32_0 = arith.constant 0 : i32
    %c0_i32_1 = arith.constant 0 : i32
    return %c0_i32, %c0_i32_0 : i32, i32
  }
  func.func @transform_13(%arg0: i32) -> (i32, i32) {
    %c0_i32 = arith.constant 0 : i32
    %c0_i32_0 = arith.constant 0 : i32
    %c0_i32_1 = arith.constant 0 : i32
    return %c0_i32, %c0_i32_0 : i32, i32
  }
  func.func @transform_14(%arg0: i32) -> (i32, i32) {
    %c0_i32 = arith.constant 0 : i32
    %c0_i32_0 = arith.constant 0 : i32
    %c0_i32_1 = arith.constant 0 : i32
    return %c0_i32, %c0_i32_0 : i32, i32
  }
}

</mosaic_0001>

<bundles_post_ra>
// kernel: forward.1
= control target key start
LH: loop header
LB: loop body
LE: loop exit
PB: predicated region body
PF: predicated region fallthrough
CT: control target
= control target key end

     0   :  { %19 = vsyncpa [#allocation3], 0  ;;  %s1376_s0 = inlined_call_operand.vmem [shape: f32[16,128], index: 0, kind: input, shape index: {}]   ;;  %s1377_s1 = inlined_call_operand.hbm [shape: bf16[128,32], index: 1, kind: input, shape index: {}]   ;;  %s1378_s2 = inlined_call_operand.hbm [shape: bf16[3,32,32], index: 2, kind: input, shape index: {}]   ;;  %s1379_s3 = inlined_call_operand.hbm [shape: bf16[32,128], index: 3, kind: input, shape index: {}]   ;;  %s1380_s4 = inlined_call_operand.hbm [shape: f32[32,4], index: 4, kind: input, shape index: {}]   ;;  %s1381_s5 = inlined_call_operand.vmem [shape: f32[4,32], index: 5, kind: input, shape index: {}]   ;;  %s1382_s6 = inlined_call_operand.vmem [shape: f32[128,16], index: 6, kind: input, shape index: {}]   ;;  %s1383_s7 = inlined_call_operand.vmem [shape: f32[16,128], index: 7, kind: input, shape index: {}]   ;;  %s1384_s8 = inlined_call_operand.hbm [shape: f32[1,4], index: 8, kind: input, shape index: {}]   ;;  %s1385_s9 = inlined_call_operand.vmem [shape: f32[1,4], index: 9, kind: input, shape index: {}]   ;;  %s1386_s10 = inlined_call_operand.vmem [shape: f32[1,4], index: 10, kind: input, shape index: {}]   ;;  %s1387_s11 = inlined_call_operand.vmem [shape: f32[1,4], index: 11, kind: input, shape index: {}]   ;;  %s1388_s12 = inlined_call_operand.vmem [shape: f32[1,16], index: 12, kind: input, shape index: {}]   ;;  %s1389_s13 = inlined_call_operand.vmem [shape: f32[1,16], index: 13, kind: input, shape index: {}]   ;;  %s1390_s14 = inlined_call_operand.vmem [shape: f32[16,128], index: 14, kind: output, shape index: {}]  }
   0x1   :  { %20 = vsyncpa [#allocation5], 0 }
   0x2   :  { %21 = vsyncpa [#allocation8], 0  ;;  %s41_s15 = sshll.u32 %s1378_s2, 4  ;;  %s1083_s16 = smov [#allocation4]   ;;  %s42_s15 = int_to_ptr.hbm [resolvable:$true] %s41_s15 }
   0x3   :  { %s43_s17 = sshll.u32 %s1083_s16, 4  ;;  %s67_s20 = sshll.u32 %s1380_s4, 4  ;;  %s44_s17 = int_to_ptr.vmem [resolvable:$true] %s43_s17  ;;  %s68_s20 = int_to_ptr.hbm [resolvable:$true] %s67_s20 }
   0x4   :  { %s1084_s21 = smov 64   ;;  %s1085_s22 = smov 4  }
   0x5   :  { %49 = dma.hbm_to_vmem [thread:$0]  %s42_s15, 768, %s44_s17, [#allocation5], %s1084_s21, %s1084_s21, %s1085_s22  }
   0x6   :  { %s1086_s23 = smov [#allocation7]   ;;  %s1087_s25 = smov 128  }
   0x7   :  { %s69_s24 = sshll.u32 %s1086_s23, 4  ;;  %s1088_s26 = smov 8   ;;  %s70_s24 = int_to_ptr.vmem [resolvable:$true] %s69_s24 }
   0x8   :  { %75 = dma.hbm_to_vmem [thread:$0]  %s68_s20, 512, %s70_s24, [#allocation8], %s1087_s25, %s1087_s25, %s1088_s26  }
   0x9   :  { %s28_s28 = sshll.u32 %s1377_s1, 4  ;;  %s1089_s29 = smov [#allocation2]   ;;  %s29_s28 = int_to_ptr.hbm [resolvable:$true] %s28_s28 }
   0xa   :  { %s30_s30 = sshll.u32 %s1089_s29, 4  ;;  %s54_s18 = sshll.u32 %s1379_s3, 4  ;;  %s31_s30 = int_to_ptr.vmem [resolvable:$true] %s30_s30  ;;  %s55_s18 = int_to_ptr.hbm [resolvable:$true] %s54_s18 }
   0xb   :  { %36 = dma.hbm_to_vmem [thread:$0]  %s29_s28, 1024, %s31_s30, [#allocation3], %s1084_s21, %s1084_s21, %s1085_s22  }
   0xc   :  { %s1090_s15 = smov [#allocation6]   ;;  %s87_s20 = sshll.u32 %s1384_s8, 4  ;;  %s88_s20 = int_to_ptr.hbm [resolvable:$true] %s87_s20 }
   0xd   :  { %s56_s17 = sshll.u32 %s1090_s15, 4  ;;  %s1091_s1 = smov [#allocation9]   ;;  %s57_s17 = int_to_ptr.vmem [resolvable:$true] %s56_s17 }
   0xe   :  { %62 = dma.hbm_to_vmem [thread:$0]  %s55_s18, 256, %s57_s17, [#allocation5], %s1084_s21, %s1084_s21, %s1085_s22  }
   0xf   :  { %s89_s24 = sshll.u32 %s1091_s1, 4  ;;  %s90_s24 = int_to_ptr.vmem [resolvable:$true] %s89_s24 }
  0x10   :  { %92 = dma.hbm_to_vmem [thread:$0]  %s88_s20, 16, %s90_s24, [#allocation8]  }
  0x11   :  { %1077 = dma.done.wait [#allocation3], 1024  }
  0x12   :  { %1078 = vsyncadd [#allocation3], 4294966272 }
  0x13   :  { %1079 = dma.done.wait [#allocation5], 1024  }
  0x14   :  { %1080 = vsyncadd [#allocation5], 4294966272 }
  0x15   :  { %1081 = dma.done.wait [#allocation8], 528  }
  0x16   :  { %1082 = vsyncadd [#allocation8], 4294966768  ;;  %v933_v0 = vld [vmem:[#allocation2 + $0x38] sm:$0xff]  ;;  %v932_v1 = vld [vmem:[#allocation2 + $0x30] sm:$0xff]  ;;  %vm212_vm0 = vcmask 261120   ;;  %vm302_vm1 = vcmask 1043456  }
  0x17   :  { %191 = vmatpush.bf16.msra.mxu0 %v933_v0  ;;  %v931_v2 = vld [vmem:[#allocation2 + $0x28] sm:$0xff]  ;;  %v930_v3 = vld [vmem:[#allocation2 + $0x20] sm:$0xff]  ;;  %v929_v4 = vld [vmem:[#allocation2 + $0x18] sm:$0xff]  ;;  %vm298_vm5 = vcmask 31744   ;;  %v357_v0 = vlaneseq }
  0x18   :  { %v928_v5 = vld [vmem:[#allocation2 + $0x10] sm:$0xff]  ;;  %v927_v6 = vld [vmem:[#allocation2 + $0x8] sm:$0xff]  ;;  %v926_v7 = vld [vmem:[#allocation2] sm:$0xff] }
  0x19   :  { %v1185_v8 = vld [vmem:[%s1376_s0] sm:$0xff]  ;;  %v1190_v9 = vld [vmem:[%s1376_s0 + $0x8] sm:$0xff]  ;;  %v1194_v11 = vld [vmem:[#allocation7 + $0x18] sm:$0xff] }
  0x1a   :  { %v126_v10 = vpack.c.bf16 %v1190_v9, %v1185_v8  ;;  %v1196_v12 = vld [vmem:[#allocation7 + $0x10] sm:$0xff]  ;;  %248 = vmatpush.msra.mxu1 %v1194_v11  ;;  %272 = vmatpush.msra.mxu2 %v1194_v11  ;;  %v1200_v13 = vld [vmem:[#allocation7 + $0x8] sm:$0xff]  ;;  %v1204_v14 = vld [vmem:[#allocation7] sm:$0xff] }
  0x1b   :  { %192 = vmatpush.bf16.msra.mxu0 %v932_v1  ;;  %v1229_v37 = vld [vmem:[%s1381_s5] sm:$0xf]  ;;  %v937_v58 = vld [vmem:[#allocation4 + $0x18] sm:$0xff]  ;;  %v935_v59 = vld [vmem:[#allocation4 + $0x8] sm:$0xff] }
  0x1c   :  { %249 = vmatpush.msra.mxu1 %v1196_v12  ;;  %273 = vmatpush.msra.mxu2 %v1196_v12  ;;  %v205_v51 = vld [vmem:[#allocation9] sm:$0x1]  ;;  %v936_v60 = vld [vmem:[#allocation4 + $0x10] sm:$0xff]  ;;  %v939_v61 = vld [vmem:[#allocation4 + $0x28] sm:$0xff] }
  0x1d   :  { %878 = vmatpush.msk.msra.mxu3 %vm302_vm1, %v1229_v37  ;;  %v206_v56 = vld [vmem:[%s1385_s9] sm:$0x1] }
  0x1e   :  { %250 = vmatpush.msra.mxu1 %v1200_v13  ;;  %274 = vmatpush.msra.mxu2 %v1200_v13  ;;  %v934_v62 = vld [vmem:[#allocation4] sm:$0xff] }
  0x1f   :  { %193 = vmatpush.bf16.msra.mxu0 %v931_v2  ;;  %880 = vmatpush.msk.msrb.mxu3 %vm302_vm1, %v1229_v37  ;;  %v938_v63 = vld [vmem:[#allocation4 + $0x20] sm:$0xff]  ;;  %v358_v2 = vshrl.u32 %v357_v0, 7 }
  0x20   :  { %251 = vmatpush.msra.mxu1 %v1204_v14  ;;  %275 = vmatpush.msra.mxu2 %v1204_v14 }
  0x21   :  { %vm397_vm6 = vcmp.lt.s32.totalorder %v358_v2, 7  ;;  %vm388_vm7 = vcmp.lt.s32.totalorder %v358_v2, 1 }
  0x22   :  { %434 = vmatpush.bf16.msrb.mxu1 %v937_v58  ;;  %463 = vmatpush.bf16.msrb.mxu2 %v935_v59 }
  0x23   :  { %194 = vmatpush.bf16.msra.mxu0 %v930_v3 }
  0x26   :  { %435 = vmatpush.bf16.msrb.mxu1 %v936_v60  ;;  %464 = vmatpush.bf16.msrb.mxu2 %v934_v62 }
  0x27   :  { %195 = vmatpush.bf16.msra.mxu0 %v929_v4  ;;  %v359_v4 = vadd.s32 8, %v358_v2 }
  0x2b   :  { %196 = vmatpush.bf16.msra.mxu0 %v928_v5 }
  0x2f   :  { %197 = vmatpush.bf16.msra.mxu0 %v927_v6 }
  0x33   :  { %198 = vmatpush.bf16.msra.mxu0 %v926_v7 }
  0x36   :  { %199 = vmatmul.bf16.vlgmr.msra.gmra.mxu0 %v126_v10 }
  0xb3   :  { %v1210_v15 = vpop.f32.mrf.mxu0 }
  0xb4   :  { %v222_v16 = vmul.f32 %v1210_v15, %v1210_v15  ;;  %v213_v18 = vsel %vm212_vm0, %v1210_v15, 0.0 }
  0xb6   :  { %v224_v22 = vsel %vm212_vm0, %v222_v16, 0.0  ;;  %v371_v16 = vand.u32 7, %v359_v4 }
  0xb8   :  { %vm1254_vm9 = vcmp.ne.s32.totalorder %v371_v16, 0  ;;  %vm1262_vm11 = vcmp.ne.s32.totalorder %v371_v16, 7 }
  0xbb   :  { %v1214_v17 = vpop.f32.mrf.mxu0 }
  0xbc   :  { %v214_v19 = vsel %vm212_vm0, %v1214_v17, 0.0  ;;  %v223_v20 = vmul.f32 %v1214_v17, %v1214_v17 }
  0xbd   :  { %v215_v21 = vadd.f32 %v214_v19, %v213_v18 }
  0xbe   :  { %v225_v23 = vsel %vm212_vm0, %v223_v20, 0.0 }
  0xbf   :  { %v216_v24 = vrot.slane %v215_v21, 4  ;;  %v226_v25 = vadd.f32 %v225_v23, %v224_v22 }
  0xc1   :  { %v217_v26 = vadd.f32 %v216_v24, %v215_v21  ;;  %v227_v27 = vrot.slane %v226_v25, 4 }
  0xc3   :  { %v218_v28 = vrot.slane %v217_v26, 2  ;;  %v228_v29 = vadd.f32 %v227_v27, %v226_v25 }
  0xc5   :  { %v219_v30 = vadd.f32 %v218_v28, %v217_v26  ;;  %v229_v31 = vrot.slane %v228_v29, 2 }
  0xc7   :  { %v220_v32 = vrot.slane %v219_v30, 1  ;;  %v230_v33 = vadd.f32 %v229_v31, %v228_v29 }
  0xc9   :  { %v221_v34 = vadd.f32 %v220_v32, %v219_v30  ;;  %v231_v35 = vrot.slane %v230_v33, 1 }
  0xcb   :  { %876 = vmatmul.msk.f32.vlgmr.msra.gmra.mxu1 %vm212_vm0, %v221_v34  ;;  %v232_v36 = vadd.f32 %v231_v35, %v230_v33 }
  0xcc   :  { %545 = vmatpush.msra.mxu1 %v1194_v11 }
  0xcd   :  { %877 = vmatmul.msk.f32.vlgmr.msra.gmra.mxu2 %vm212_vm0, %v232_v36 }
  0xce   :  { %546 = vmatpush.msra.mxu1 %v1196_v12  ;;  %569 = vmatpush.msra.mxu2 %v1194_v11  ;;  %v364_v11 = vand.u32 7, %v358_v2 }
  0xd0   :  { %547 = vmatpush.msra.mxu1 %v1200_v13  ;;  %570 = vmatpush.msra.mxu2 %v1196_v12  ;;  %vm1250_vm8 = vcmp.ne.s32.totalorder %v364_v11, 0  ;;  %vm1258_vm10 = vcmp.ne.s32.totalorder %v364_v11, 7 }
  0xd2   :  { %548 = vmatpush.msra.mxu1 %v1204_v14  ;;  %571 = vmatpush.msra.mxu2 %v1200_v13 }
  0xd4   :  { %572 = vmatpush.msra.mxu2 %v1204_v14  ;;  %v508_v14 = vld [vmem:[%s1386_s10] sm:$0x1] }
 0x148   :  { %v253_v38 = vpop.f32.mrf.mxu1 }
 0x149   :  { %v256_v39 = vmul.f32 0.0078125, %v253_v38 }
 0x14b   :  { %v281_v41 = vmul.f32 %v256_v39, %v256_v39 }
 0x150   :  { %v277_v40 = vpop.f32.mrf.mxu2 }
 0x151   :  { %v280_v42 = vmul.f32 0.0078125, %v277_v40 }
 0x153   :  { %v282_v43 = vsub.f32 %v280_v42, %v281_v41 }
 0x155   :  { %v283_v44 = vmax.f32 %v282_v43, 0.0 }
 0x157   :  { %v284_v45 = vadd.f32 1e-05, %v283_v44 }
 0x159   :  { %951 = vrsqrt.f32 %v284_v45  ;;  %vm291_vm3 = vweird.f32 %v284_v45 }
 0x15f   :  { %v952_v46 = vpop.eup %951 }
 0x160   :  { %v286_v47 = vmul.f32 %v952_v46, %v284_v45  ;;  %vm292_vm2 = vweird.f32 %v952_v46 }
 0x161   :  { %vm293_vm4 = vmor %vm291_vm3, %vm292_vm2  ;;  %vm778_vm2 = vcmask 130048  }
 0x162   :  { %v287_v48 = vmul.f32 %v952_v46, %v286_v47 }
 0x164   :  { %v288_v49 = vmul.f32 0.5, %v287_v48 }
 0x166   :  { %v289_v50 = vsub.f32 1.5, %v288_v49 }
 0x168   :  { %v290_v52 = vmul.f32 %v952_v46, %v289_v50 }
 0x16a   :  { %v294_v53 = vsel %vm293_vm4, %v952_v46, %v290_v52 }
 0x16b   :  { %v295_v54 = vmul.f32 %v294_v53, %v205_v51 }
 0x16d   :  { %879 = vmatmul.msk.f32.vlgmr.msra.gmra.mxu3 %vm298_vm5, %v295_v54  ;;  %v296_v55 = vmul.f32 %v295_v54, %v256_v39 }
 0x16e   :  { %498 = vmatpush.bf16.msra.mxu3 %v939_v61 }
 0x16f   :  { %v297_v57 = vsub.f32 %v206_v56, %v296_v55 }
 0x172   :  { %499 = vmatpush.bf16.msra.mxu3 %v938_v63 }
 0x175   :  { %881 = vmatmul.msk.f32.vlgmr.msrb.gmra.mxu3 %vm298_vm5, %v297_v57 }
 0x1f0   :  { %v323_v1 = vpop.f32.mrf.mxu3 }
 0x1f1   :  { %v349_v3 = vperm.slane %v323_v1, 0 }
 0x1f3   :  { %v350_v6 = vmul.f32 %v349_v3, %v1210_v15  ;;  %v351_v7 = vmul.f32 %v349_v3, %v1214_v17 }
 0x1f8   :  { %v346_v5 = vpop.f32.mrf.mxu3 }
 0x1f9   :  { %v352_v10 = vperm.slane %v346_v5, 0 }
 0x1fb   :  { %v353_v12 = vadd.f32 %v352_v10, %v350_v6  ;;  %v354_v18 = vadd.f32 %v352_v10, %v351_v7 }
 0x1fd   :  { %v355_v19 = vmax.f32 %v353_v12, 0.0  ;;  %v356_v20 = vmax.f32 %v354_v18, 0.0 }
 0x1ff   :  { %v386_v21 = vrot.slane %v355_v19, 7  ;;  %v387_v22 = vrot.slane %v356_v20, 7  ;;  %v395_v23 = vrot.slane %v355_v19, 1  ;;  %v396_v24 = vrot.slane %v356_v20, 1 }
 0x200   :  { %v407_v25 = vpack.c.bf16 %v356_v20, %v355_v19 }
 0x201   :  { %v398_v26 = vsel %vm397_vm6, %v395_v23, %v396_v24  ;;  %v399_v27 = vsel %vm397_vm6, %v396_v24, %v395_v23  ;;  %v389_v28 = vsel %vm388_vm7, %v386_v21, %v387_v22  ;;  %v390_v29 = vsel %vm388_vm7, %v387_v22, %v386_v21  ;;  %v509_v21 = vld [vmem:[%s1387_s11] sm:$0x1]  ;;  %v941_v24 = vld [vmem:[#allocation6 + $0x8] sm:$0xff] }
 0x202   :  { %890 = vmatmul.msk.bf16.vlgmr.msrb.gmra.mxu1 %vm212_vm0, %v407_v25  ;;  %v391_v30 = vsel %vm1250_vm8, %v390_v29, 0.0  ;;  %v392_v31 = vsel %vm1254_vm9, %v389_v28, 0.0  ;;  %v400_v32 = vsel %vm1258_vm10, %v398_v26, 0.0  ;;  %v401_v33 = vsel %vm1262_vm11, %v399_v27, 0.0  ;;  %v940_v25 = vld [vmem:[#allocation6] sm:$0xff]  ;;  %v700_v26 = vld [vmem:[%s1382_s6 + $0x78] sm:$0xff] }
 0x203   :  { %v402_v34 = vpack.c.bf16 %v392_v31, %v391_v30  ;;  %v471_v35 = vpack.c.bf16 %v401_v33, %v400_v32  ;;  %913 = vmatpush.msk.msrb.mxu1 %vm302_vm1, %v1229_v37  ;;  %v699_v27 = vld [vmem:[%s1382_s6 + $0x70] sm:$0xff]  ;;  %719 = vmatpush.msrb.mxu0 %v700_v26  ;;  %v698_v28 = vld [vmem:[%s1382_s6 + $0x68] sm:$0xff]  ;;  %v697_v29 = vld [vmem:[%s1382_s6 + $0x60] sm:$0xff] }
 0x204   :  { %740 = vmatpush.msrb.mxu3 %v700_v26 }
 0x205   :  { %899 = vmatmul.msk.bf16.vlgmr.msrb.gmra.mxu2 %vm212_vm0, %v402_v34  ;;  %908 = vmatmul.msk.bf16.vlgmr.msra.gmra.mxu3 %vm212_vm0, %v471_v35 }
 0x206   :  { %911 = vmatpush.msk.msrb.mxu2 %vm302_vm1, %v1229_v37  ;;  %720 = vmatpush.msrb.mxu0 %v699_v27 }
 0x207   :  { %741 = vmatpush.msrb.mxu3 %v699_v27 }
 0x208   :  { %721 = vmatpush.msrb.mxu0 %v698_v28 }
 0x209   :  { %742 = vmatpush.msrb.mxu3 %v698_v28 }
 0x20a   :  { %722 = vmatpush.msrb.mxu0 %v697_v29 }
 0x20b   :  { %743 = vmatpush.msrb.mxu3 %v697_v29  ;;  %v684_v29 = vld [vmem:[%s1389_s13] sm:$0x1] }
 0x27f   :  { %v437_v36 = vpop.f32.mrf.mxu1 }
 0x287   :  { %v439_v42 = vpop.f32.mrf.mxu1 }
 0x288   :  { %v466_v38 = vpop.f32.mrf.mxu2  ;;  %v501_v39 = vpop.f32.mrf.mxu3 }
 0x289   :  { %v467_v40 = vadd.f32 %v466_v38, %v437_v36 }
 0x28b   :  { %v1281_v41 = vadd.f32 %v501_v39, %v467_v40 }
 0x28d   :  { %v519_v46 = vmul.f32 %v1281_v41, %v1281_v41  ;;  %v510_v48 = vsel %vm212_vm0, %v1281_v41, 0.0 }
 0x28f   :  { %v521_v51 = vsel %vm212_vm0, %v519_v46, 0.0  ;;  %v692_v46 = vld [vmem:[%s1382_s6 + $0x38] sm:$0xff] }
 0x290   :  { %v468_v43 = vpop.f32.mrf.mxu2  ;;  %v503_v45 = vpop.f32.mrf.mxu3 }
 0x291   :  { %v469_v44 = vadd.f32 %v468_v43, %v439_v42  ;;  %v696_v43 = vld [vmem:[%s1382_s6 + $0x58] sm:$0xff] }
 0x292   :  { %723 = vmatpush.msrb.mxu0 %v696_v43  ;;  %744 = vmatpush.msrb.mxu3 %v696_v43 }
 0x293   :  { %v1285_v47 = vadd.f32 %v503_v45, %v469_v44  ;;  %v695_v44 = vld [vmem:[%s1382_s6 + $0x50] sm:$0xff]  ;;  %v693_v45 = vld [vmem:[%s1382_s6 + $0x40] sm:$0xff] }
 0x294   :  { %724 = vmatpush.msrb.mxu0 %v695_v44  ;;  %745 = vmatpush.msrb.mxu3 %v695_v44 }
 0x295   :  { %v511_v37 = vsel %vm212_vm0, %v1285_v47, 0.0  ;;  %v520_v49 = vmul.f32 %v1285_v47, %v1285_v47 }
 0x296   :  { %v512_v50 = vadd.f32 %v511_v37, %v510_v48  ;;  %v690_v48 = vld [vmem:[%s1382_s6 + $0x28] sm:$0xff]  ;;  %v689_v37 = vld [vmem:[%s1382_s6 + $0x20] sm:$0xff] }
 0x297   :  { %v522_v52 = vsel %vm212_vm0, %v520_v49, 0.0  ;;  %v688_v49 = vld [vmem:[%s1382_s6 + $0x18] sm:$0xff] }
 0x298   :  { %v513_v53 = vrot.slane %v512_v50, 4  ;;  %v523_v54 = vadd.f32 %v522_v52, %v521_v51  ;;  %v686_v51 = vld [vmem:[%s1382_s6 + $0x8] sm:$0xff]  ;;  %v685_v52 = vld [vmem:[%s1382_s6] sm:$0xff] }
 0x29a   :  { %v514_v55 = vadd.f32 %v513_v53, %v512_v50  ;;  %v524_v56 = vrot.slane %v523_v54, 4  ;;  %v687_v50 = vld [vmem:[%s1382_s6 + $0x10] sm:$0xff] }
 0x29c   :  { %v515_v57 = vrot.slane %v514_v55, 2  ;;  %v525_v58 = vadd.f32 %v524_v56, %v523_v54 }
 0x29e   :  { %v516_v59 = vadd.f32 %v515_v57, %v514_v55  ;;  %v526_v60 = vrot.slane %v525_v58, 2 }
 0x2a0   :  { %v517_v61 = vrot.slane %v516_v59, 1  ;;  %v527_v62 = vadd.f32 %v526_v60, %v525_v58 }
 0x2a2   :  { %v518_v63 = vadd.f32 %v517_v61, %v516_v59  ;;  %v528_v0 = vrot.slane %v527_v62, 1 }
 0x2a4   :  { %909 = vmatmul.msk.f32.vlgmr.msra.gmra.mxu1 %vm212_vm0, %v518_v63  ;;  %v529_v1 = vadd.f32 %v528_v0, %v527_v62 }
 0x2a6   :  { %910 = vmatmul.msk.f32.vlgmr.msra.gmra.mxu2 %vm212_vm0, %v529_v1 }
 0x2a7   :  { %675 = vmatpush.bf16.msra.mxu2 %v941_v24  ;;  %v683_v24 = vld [vmem:[%s1388_s12] sm:$0x1] }
 0x2ab   :  { %676 = vmatpush.bf16.msra.mxu2 %v940_v25 }
 0x321   :  { %v550_v2 = vpop.f32.mrf.mxu1 }
 0x322   :  { %v553_v3 = vmul.f32 0.0078125, %v550_v2 }
 0x324   :  { %v578_v5 = vmul.f32 %v553_v3, %v553_v3 }
 0x329   :  { %v574_v4 = vpop.f32.mrf.mxu2 }
 0x32a   :  { %v577_v6 = vmul.f32 0.0078125, %v574_v4 }
 0x32c   :  { %v579_v7 = vsub.f32 %v577_v6, %v578_v5 }
 0x32e   :  { %v580_v10 = vmax.f32 %v579_v7, 0.0 }
 0x330   :  { %v581_v11 = vadd.f32 1e-05, %v580_v10  ;;  %v702_v10 = vld [vmem:[%s1383_s7 + $0x8] sm:$0xff] }
 0x331   :  { %796 = vmatpush.msra.mxu1 %v702_v10 }
 0x332   :  { %953 = vrsqrt.f32 %v581_v11  ;;  %vm588_vm13 = vweird.f32 %v581_v11 }
 0x338   :  { %v954_v16 = vpop.eup %953 }
 0x339   :  { %v583_v12 = vmul.f32 %v954_v16, %v581_v11  ;;  %vm589_vm12 = vweird.f32 %v954_v16  ;;  %v701_v11 = vld [vmem:[%s1383_s7] sm:$0xff] }
 0x33a   :  { %vm590_vm14 = vmor %vm588_vm13, %vm589_vm12  ;;  %797 = vmatpush.msra.mxu1 %v701_v11 }
 0x33b   :  { %v584_v18 = vmul.f32 %v954_v16, %v583_v12 }
 0x33d   :  { %v585_v19 = vmul.f32 0.5, %v584_v18 }
 0x33f   :  { %v586_v20 = vsub.f32 1.5, %v585_v19 }
 0x341   :  { %v587_v13 = vmul.f32 %v954_v16, %v586_v20 }
 0x343   :  { %v591_v15 = vsel %vm590_vm14, %v954_v16, %v587_v13 }
 0x344   :  { %v592_v17 = vmul.f32 %v591_v15, %v508_v14 }
 0x346   :  { %912 = vmatmul.msk.f32.vlgmr.msrb.gmra.mxu2 %vm298_vm5, %v592_v17  ;;  %v593_v22 = vmul.f32 %v592_v17, %v553_v3 }
 0x348   :  { %v594_v23 = vsub.f32 %v509_v21, %v593_v22 }
 0x34a   :  { %914 = vmatmul.msk.f32.vlgmr.msrb.gmra.mxu1 %vm298_vm5, %v594_v23 }
 0x34b   :  { %819 = vmatpush.msrb.mxu1 %v702_v10 }
 0x34d   :  { %820 = vmatpush.msrb.mxu1 %v701_v11 }
 0x3c7   :  { %v638_v30 = vpop.f32.mrf.mxu1 }
 0x3c8   :  { %v644_v33 = vperm.slane %v638_v30, 0 }
 0x3c9   :  { %v615_v31 = vpop.f32.mrf.mxu2 }
 0x3ca   :  { %v641_v32 = vperm.slane %v615_v31, 0 }
 0x3cc   :  { %v642_v34 = vmul.f32 %v641_v32, %v1281_v41  ;;  %v643_v35 = vmul.f32 %v641_v32, %v1285_v47  ;;  %v694_v41 = vld [vmem:[%s1382_s6 + $0x48] sm:$0xff]  ;;  %v691_v47 = vld [vmem:[%s1382_s6 + $0x30] sm:$0xff] }
 0x3cd   :  { %725 = vmatpush.msrb.mxu0 %v694_v41  ;;  %746 = vmatpush.msrb.mxu3 %v694_v41 }
 0x3ce   :  { %v645_v36 = vadd.f32 %v644_v33, %v642_v34  ;;  %v646_v38 = vadd.f32 %v644_v33, %v643_v35 }
 0x3cf   :  { %726 = vmatpush.msrb.mxu0 %v693_v45  ;;  %747 = vmatpush.msrb.mxu3 %v693_v45 }
 0x3d0   :  { %v647_v39 = vmax.f32 %v645_v36, 0.0  ;;  %v648_v40 = vmax.f32 %v646_v38, 0.0 }
 0x3d1   :  { %727 = vmatpush.msrb.mxu0 %v692_v46  ;;  %748 = vmatpush.msrb.mxu3 %v692_v46 }
 0x3d2   :  { %v649_v42 = vpack.c.bf16 %v648_v40, %v647_v39 }
 0x3d3   :  { %728 = vmatpush.msrb.mxu0 %v691_v47  ;;  %749 = vmatpush.msrb.mxu3 %v691_v47 }
 0x3d4   :  { %923 = vmatmul.msk.bf16.vlgmr.msra.gmra.mxu2 %vm212_vm0, %v649_v42 }
 0x3d5   :  { %729 = vmatpush.msrb.mxu0 %v690_v48  ;;  %750 = vmatpush.msrb.mxu3 %v690_v48 }
 0x3d7   :  { %730 = vmatpush.msrb.mxu0 %v689_v37  ;;  %751 = vmatpush.msrb.mxu3 %v689_v37 }
 0x3d9   :  { %731 = vmatpush.msrb.mxu0 %v688_v49  ;;  %752 = vmatpush.msrb.mxu3 %v688_v49 }
 0x3db   :  { %732 = vmatpush.msrb.mxu0 %v687_v50  ;;  %753 = vmatpush.msrb.mxu3 %v687_v50 }
 0x3dd   :  { %733 = vmatpush.msrb.mxu0 %v686_v51  ;;  %754 = vmatpush.msrb.mxu3 %v686_v51 }
 0x3df   :  { %734 = vmatpush.msrb.mxu0 %v685_v52  ;;  %755 = vmatpush.msrb.mxu3 %v685_v52 }
 0x457   :  { %v678_v53 = vpop.f32.mrf.mxu2 }
 0x458   :  { %v710_v55 = vmul.f32 %v678_v53, %v678_v53 }
 0x45f   :  { %v680_v54 = vpop.f32.mrf.mxu2 }
 0x460   :  { %v703_v56 = vadd.f32 %v680_v54, %v678_v53  ;;  %v711_v57 = vmul.f32 %v680_v54, %v680_v54 }
 0x462   :  { %v704_v58 = vrot.slane %v703_v56, 4  ;;  %v712_v59 = vadd.f32 %v711_v57, %v710_v55 }
 0x464   :  { %v705_v60 = vadd.f32 %v704_v58, %v703_v56  ;;  %v713_v61 = vrot.slane %v712_v59, 4 }
 0x466   :  { %v706_v62 = vrot.slane %v705_v60, 2  ;;  %v714_v63 = vadd.f32 %v713_v61, %v712_v59 }
 0x468   :  { %v707_v0 = vadd.f32 %v706_v62, %v705_v60  ;;  %v715_v1 = vrot.slane %v714_v63, 2 }
 0x46a   :  { %v716_v2 = vadd.f32 %v715_v1, %v714_v63  ;;  %v708_v3 = vrot.slane %v707_v0, 1 }
 0x46c   :  { %v709_v4 = vadd.f32 %v708_v3, %v707_v0  ;;  %v717_v5 = vrot.slane %v716_v2, 1 }
 0x46e   :  { %735 = vmatmul.f32.vlgmr.msrb.gmra.mxu0 %v709_v4  ;;  %v718_v6 = vadd.f32 %v717_v5, %v716_v2 }
 0x470   :  { %756 = vmatmul.f32.vlgmr.msrb.gmra.mxu3 %v718_v6 }
 0x4eb   :  { %v736_v7 = vpop.f32.mrf.mxu0 }
 0x4ec   :  { %v739_v16 = vmul.f32 0.0078125, %v736_v7 }
 0x4ee   :  { %v761_v18 = vmul.f32 %v739_v16, %v739_v16 }
 0x4f3   :  { %v757_v12 = vpop.f32.mrf.mxu3 }
 0x4f4   :  { %v760_v19 = vmul.f32 0.0078125, %v757_v12 }
 0x4f6   :  { %v762_v20 = vsub.f32 %v760_v19, %v761_v18 }
 0x4f8   :  { %v763_v13 = vmax.f32 %v762_v20, 0.0 }
 0x4fa   :  { %v764_v14 = vadd.f32 1e-05, %v763_v13 }
 0x4fc   :  { %955 = vrsqrt.f32 %v764_v14  ;;  %vm771_vm0 = vweird.f32 %v764_v14 }
 0x502   :  { %v956_v15 = vpop.eup %955 }
 0x503   :  { %v766_v17 = vmul.f32 %v956_v15, %v764_v14  ;;  %vm772_vm15 = vweird.f32 %v956_v15 }
 0x504   :  { %vm773_vm1 = vmor %vm771_vm0, %vm772_vm15 }
 0x505   :  { %v767_v21 = vmul.f32 %v956_v15, %v766_v17 }
 0x507   :  { %v768_v22 = vmul.f32 0.5, %v767_v21 }
 0x509   :  { %v769_v23 = vsub.f32 1.5, %v768_v22 }
 0x50b   :  { %v770_v25 = vmul.f32 %v956_v15, %v769_v23 }
 0x50d   :  { %v774_v26 = vsel %vm773_vm1, %v956_v15, %v770_v25 }
 0x50e   :  { %v775_v27 = vmul.f32 %v774_v26, %v683_v24 }
 0x510   :  { %924 = vmatmul.msk.f32.vlgmr.msra.gmra.mxu1 %vm778_vm2, %v775_v27  ;;  %v776_v28 = vmul.f32 %v775_v27, %v739_v16 }
 0x512   :  { %v777_v30 = vsub.f32 %v684_v29, %v776_v28 }
 0x518   :  { %925 = vmatmul.msk.f32.vlgmr.msrb.gmra.mxu1 %vm778_vm2, %v777_v30 }
 0x58d   :  { %v799_v31 = vpop.f32.mrf.mxu1 }
 0x58e   :  { %v825_v32 = vperm.slane %v799_v31, 0 }
 0x590   :  { %v826_v34 = vmul.f32 %v825_v32, %v678_v53  ;;  %v827_v35 = vmul.f32 %v825_v32, %v680_v54 }
 0x595   :  { %v822_v33 = vpop.f32.mrf.mxu1 }
 0x596   :  { %v828_v36 = vperm.slane %v822_v33, 0 }
 0x598   :  { %v829_v38 = vadd.f32 %v828_v36, %v826_v34  ;;  %v830_v39 = vadd.f32 %v828_v36, %v827_v35 }
 0x59a   :  { %v831_v40 = vadd.f32 %v829_v38, %v1185_v8  ;;  %v832_v42 = vadd.f32 %v830_v39, %v1190_v9 }
 0x59c   :  { %v833_v43 = vmax.f32 %v831_v40, 0.0  ;;  %v834_v44 = vmax.f32 %v832_v42, 0.0 }
 0x59e   :  { %835 = vst [vmem:[%s1390_s14] sm:$0xff] %v833_v43 }
 0x59f   :  { %836 = vst [vmem:[%s1390_s14 + $0x8] sm:$0xff] %v834_v44 }
 0x5a0   :  { %841 = vsyncpa [#allocation3], 1 }
 0x5a1   :  { %842 = vsyncpa [#allocation5], 1 }
 0x5a2   :  { %843 = vsyncpa [#allocation8], 1 }

</bundles_post_ra>
